<compile_context>
chip_gen: v7x
topology: tpu7x:2x2x1
jax: 0.10.0
libtpu: 0.0.40
codegen_flags: <defaults>
</compile_context>

<pallas_src>
import functools

import jax
import jax.numpy as jnp
from jax.experimental import pallas as pl
from jax.experimental.pallas import tpu as pltpu


_LANE = 128
_DEFAULT_TILE_ROWS = 2048   # 2048 rows x 128 lanes = 262144 batch elems / grid step


def _mtl_sse_kernel(*refs, n_tasks, tile_rows, steps, rows_valid):
    """Per-split, per-task sum of squared errors over the batch.

    refs = (pred_ref_0, ..., pred_ref_{T-1}, lab_ref, out_ref, acc_ref)

      pred_ref_j : [tile_rows, 128] tile of task j's predictions
      lab_ref    : [T, tile_rows, 128] tile of the task-major labels
      out_ref    : [1, T, 128] per-split partial sums (lane reduce in wrapper)
      acc_ref    : [T, tile_rows, 128] f32 VMEM accumulator (per core)
    """
    pred_refs = refs[:n_tasks]
    lab_ref = refs[n_tasks]
    out_ref = refs[n_tasks + 1]
    acc_ref = refs[n_tasks + 2]

    s = pl.program_id(0)            # batch split (parallel -> 2 TCs on v7x)
    k = pl.program_id(1)            # batch tile within the split (reduction)

    @pl.when(k == 0)
    def _():
        acc_ref[...] = jnp.zeros_like(acc_ref)

    # Row-validity mask built from the *unclamped* tile index: it zeroes the
    # ragged last block and any duplicated (index-clamped) tail tile of the
    # split axis, so no padding to tile multiples is ever required.
    base_row = (s * steps + k) * tile_rows
    row_ids = base_row + jax.lax.broadcasted_iota(jnp.int32, (tile_rows, _LANE), 0)
    valid = row_ids < rows_valid                                   # [tile_rows, 128]

    for j in range(n_tasks):        # static unroll; n_tasks is tiny
        d = pred_refs[j][...].astype(jnp.float32) - lab_ref[j].astype(jnp.float32)
        d = jnp.where(valid, d, 0.0)
        acc_ref[j] += d * d         # deferred (elementwise) accumulation, pure VALU

    @pl.when(k == pl.num_programs(1) - 1)
    def _():
        # Reduce only the row (sublane) axis here; the final 128-lane reduce
        # and the loss combination are a few scalar ops in the wrapper.
        for j in range(n_tasks):
            out_ref[0:1, j:j + 1, :] = (
                jnp.sum(acc_ref[j], axis=0, keepdims=True)[None])  # [1, 1, 128]


def _mtl_partial_sse(preds3, labs3, *, tile_rows=_DEFAULT_TILE_ROWS):
    """preds3: list of T [rows, 128] arrays; labs3: [T, rows, 128].
    Returns [SPLIT, T, 128] f32 partial sums of squared errors."""
    n_tasks, rows, lanes = labs3.shape
    assert lanes == _LANE
    assert len(preds3) == n_tasks
    for p in preds3:
        assert p.shape == (rows, _LANE), p.shape

    tile_rows = int(tile_rows)
    if tile_rows >= rows:
        tile_rows = rows                             # single (full) block
    else:
        tile_rows = max((tile_rows // 8) * 8, 8)     # keep (8,128) alignment
    c_tiles = pl.cdiv(rows, tile_rows)
    split = 2 if c_tiles >= 2 else 1                 # one split per TC on v7x
    steps = pl.cdiv(c_tiles, split)
    overshoot = split * steps > c_tiles

    def tile_idx(s, k):
        t = s * steps + k
        # Clamp fully out-of-range tail tiles (they are masked in-kernel).
        return jnp.minimum(t, c_tiles - 1) if overshoot else t

    pred_spec = pl.BlockSpec((tile_rows, _LANE), lambda s, k: (tile_idx(s, k), 0))
    lab_spec = pl.BlockSpec((n_tasks, tile_rows, _LANE),
                            lambda s, k: (0, tile_idx(s, k), 0))
    in_specs = [pred_spec] * n_tasks + [lab_spec]

    kernel = functools.partial(
        _mtl_sse_kernel, n_tasks=n_tasks, tile_rows=tile_rows, steps=steps,
        rows_valid=rows)

    # Actual VMEM: double-buffered pred + label blocks, the accumulator and the
    # tiny output block; explicit limit so large tiles compile on every
    # generation (v5e's 16 MiB scoped default, v7x's 64 MiB physical).
    blk = tile_rows * _LANE * 4
    vmem_est = (2 * n_tasks * blk        # T pred blocks, double buffered
                + 2 * n_tasks * blk      # label block, double buffered
                + n_tasks * blk          # f32 accumulator scratch
                + 2 * n_tasks * _LANE * 4)
    vmem_limit = int(min(max(vmem_est + (8 << 20), 32 << 20), 96 << 20))

    bytes_in = sum(int(p.size) * p.dtype.itemsize for p in preds3)
    bytes_in += int(labs3.size) * labs3.dtype.itemsize
    cost = pl.CostEstimate(
        flops=3 * n_tasks * rows * _LANE,
        transcendentals=0,
        bytes_accessed=bytes_in + split * n_tasks * _LANE * 4)

    return pl.pallas_call(
        kernel,
        out_shape=jax.ShapeDtypeStruct((split, n_tasks, _LANE), jnp.float32),
        grid_spec=pltpu.PrefetchScalarGridSpec(
            num_scalar_prefetch=0,
            grid=(split, steps),
            in_specs=in_specs,
            out_specs=pl.BlockSpec((1, n_tasks, _LANE), lambda s, k: (s, 0, 0)),
            scratch_shapes=[pltpu.VMEM((n_tasks, tile_rows, _LANE), jnp.float32)]),
        compiler_params=pltpu.CompilerParams(
            dimension_semantics=("parallel", "arbitrary"),
            vmem_limit_bytes=vmem_limit),
        cost_estimate=cost,
    )(*preds3, labs3)


class MultiTaskLossPallas:
    """JAX/Pallas port of MultiTaskLoss (forward pass only)."""

    def __init__(self, training_params):
        self.regression_names = training_params['regression_names']
        self.main_task = training_params['main_task'][0]
        self.loss_weights = {}
        for task_name in self.regression_names:
            if self.main_task in task_name:
                self.loss_weights[task_name] = training_params['main_loss_weight']
            elif training_params['auxillary_loss_weight'] != 0:
                self.loss_weights[task_name] = training_params['auxillary_loss_weight']
        self.task_names = list(self.loss_weights.keys())
        self.use_awl = training_params['adaptive_loss_name'] == 'awl'
        # AWL params: torch.ones(num) in the reference __init__ (deterministic).
        self.awl_params = jnp.ones((len(self.task_names),), dtype=jnp.float32)
        self.tile_rows = int(training_params.get('tile_rows', _DEFAULT_TILE_ROWS))

    def forward(self, out, label):
        names = self.task_names
        n_tasks = len(names)
        n = label.shape[0]
        rows = -(-n // _LANE)                 # cdiv
        n128 = rows * _LANE
        pad = n128 - n

        # Per-task predictions passed to the kernel directly (no jnp.stack).
        # When n % 128 == 0 the [N,1] -> [rows,128] reshape is a free view;
        # otherwise a single 128-lane zero pad is applied (padded diffs are 0).
        preds3 = []
        for name in names:
            p = out[name].reshape(-1)
            if pad:
                p = jnp.pad(p, (0, pad))
            preds3.append(p.reshape(rows, _LANE))

        # Labels: one task-major, batch-dense re-layout pass.
        # TODO(synk): have the dataloader/model emit task-major [T, N] labels
        # directly so this gather/transpose pass disappears too.
        cols = [self.regression_names.index(name) for name in names]
        labs = jnp.stack([label[:, c] for c in cols], axis=0)        # [T, N]
        if pad:
            labs = jnp.pad(labs, ((0, 0), (0, pad)))
        labs3 = labs.reshape(n_tasks, rows, _LANE)

        partials = _mtl_partial_sse(preds3, labs3,
                                    tile_rows=self.tile_rows)        # [S, T, 128]

        # Tiny wrapper-side finalize on T scalars (lane reduce, split combine,
        # MSE divide, AWL / weighted-sum total).
        sse = jnp.sum(partials, axis=(0, 2))                         # [T]
        per_task = sse / jnp.float32(n)
        losses = {name: per_task[i] for i, name in enumerate(names)}

        w = jnp.asarray([self.loss_weights[nm] for nm in names], jnp.float32)
        if self.use_awl:
            p2 = self.awl_params.astype(jnp.float32) ** 2
            # 0.5 / p_i^2 * loss_i * w_i + log(1 + p_i^2)   (weights-dict path)
            total = jnp.sum(0.5 / p2 * per_task * w + jnp.log1p(p2))
        else:
            total = jnp.sum(w * per_task)
        losses['total'] = total
        return losses

    __call__ = forward


def _reference(out, label, mtl):
    """Pure-JAX reference for correctness checking."""
    losses = {}
    for name in mtl.task_names:
        pred = out[name].reshape(-1).astype(jnp.float32)
        lab = label[:, mtl.regression_names.index(name)].astype(jnp.float32)
        losses[name] = jnp.mean((pred - lab) ** 2)
    if mtl.use_awl:
        total = 0.0
        for i, name in enumerate(mtl.task_names):
            p = mtl.awl_params[i]
            total = total + 0.5 / (p ** 2) * losses[name] * mtl.loss_weights[name] \
                    + jnp.log(1 + p ** 2)
    else:
        total = sum(mtl.loss_weights[name] * losses[name] for name in mtl.task_names)
    losses['total'] = total
    return losses


def _make_inputs(key, n, regression_names):
    ks = jax.random.split(key, len(regression_names) + 1)
    out = {name: jax.random.normal(ks[i], (n, 1), dtype=jnp.float32)
           for i, name in enumerate(regression_names)}
    label = jax.random.normal(ks[-1], (n, len(regression_names)), dtype=jnp.float32)
    return out, label


def _check(mtl, out, label):
    losses = mtl(out, label)
    jax.block_until_ready(losses['total'])
    ref = _reference(out, label, mtl)
    for name in list(mtl.task_names) + ['total']:
        assert jnp.allclose(losses[name], ref[name], rtol=1e-5, atol=1e-5), (
            name, losses[name], ref[name])


if __name__ == "__main__":
    regression_names = ['VO2rel_patch', 'HR_patch', 'RR_patch']
    base_params = {
        'regression_names': regression_names,
        'device': None,
        'main_task': ['VO2'],
        'main_loss_weight': 1.0,
        'auxillary_loss_weight': 0.3,
    }
    key = jax.random.PRNGKey(0)
    k1, k2, k3 = jax.random.split(key, 3)

    # 1) AWL path, tiny batch (single padded 128-lane row, single tile).
    mtl_awl = MultiTaskLossPallas(dict(base_params, adaptive_loss_name='awl'))
    out1, label1 = _make_inputs(k1, 16, regression_names)
    _check(mtl_awl, out1, label1)

    # 2) Weighted-sum path, ragged batch with a small tile so the kernel runs a
    #    multi-tile grid: SPLIT=2 "parallel" axis, clamped duplicate tail tile,
    #    partial last block masking and 128-lane padding all exercised.
    mtl_ws = MultiTaskLossPallas(dict(base_params, adaptive_loss_name='none',
                                      tile_rows=8))
    out2, label2 = _make_inputs(k2, 2550, regression_names)
    _check(mtl_ws, out2, label2)

    # 3) AWL path, batch an exact multiple of 128 (zero-copy prediction reshape
    #    path, default tile -> single dense block).
    mtl_awl2 = MultiTaskLossPallas(dict(base_params, adaptive_loss_name='awl'))
    out3, label3 = _make_inputs(k3, 1024, regression_names)
    _check(mtl_awl2, out3, label3)

    print("KERNEL_OK")
</pallas_src>

<mosaic_0001>
module attributes {stable_mosaic.version = 11 : i64} {
  func.func @_mtl_sse_kernel(%arg0: i32, %arg1: i32, %arg2: memref<1x128xf32, #tpu.memory_space<vmem>>, %arg3: memref<1x128xf32, #tpu.memory_space<vmem>>, %arg4: memref<1x128xf32, #tpu.memory_space<vmem>>, %arg5: memref<3x1x128xf32, #tpu.memory_space<vmem>>, %arg6: memref<1x3x128xf32, #tpu.memory_space<vmem>>, %arg7: memref<3x1x128xf32, #tpu.memory_space<vmem>>) attributes {dimension_semantics = [#tpu.dimension_semantics<parallel>, #tpu.dimension_semantics<arbitrary>], iteration_bounds = array<i64: 1, 1>, scalar_prefetch = 0 : i64, scratch_operands = 1 : i64, tpu.core_type = #tpu.core_type<tc>, window_params = [{transform_indices = @transform_0, window_bounds = array<i64: 1, 128>}, {transform_indices = @transform_1, window_bounds = array<i64: 1, 128>}, {transform_indices = @transform_2, window_bounds = array<i64: 1, 128>}, {transform_indices = @transform_3, window_bounds = array<i64: 3, 1, 128>}, {transform_indices = @transform_4, window_bounds = array<i64: 1, 3, 128>}]} {
    %c0_i32 = arith.constant 0 : i32
    %0 = arith.cmpi eq, %arg1, %c0_i32 : i32
    %1 = arith.extui %0 : i1 to i32
    %c0_i32_0 = arith.constant 0 : i32
    %2 = arith.cmpi ne, %1, %c0_i32_0 : i32
    scf.if %2 {
      %cst_37 = arith.constant 0.000000e+00 : f32
      %53 = vector.broadcast %cst_37 : f32 to vector<3x1x128xf32>
      %c0_38 = arith.constant 0 : index
      %c0_39 = arith.constant 0 : index
      %c0_40 = arith.constant 0 : index
      %54 = vector.load %arg7[%c0_38, %c0_39, %c0_40] : memref<3x1x128xf32, #tpu.memory_space<vmem>>, vector<3x1x128xf32>
      tpu.vector_store %arg7[%c0_38, %c0_39, %c0_40], %53 {strides = array<i32>} : memref<3x1x128xf32, #tpu.memory_space<vmem>>, vector<3x1x128xf32>,
    } else {
    }
    %c1_i32 = arith.constant 1 : i32
    %3 = arith.muli %arg0, %c1_i32 : i32
    %4 = arith.addi %3, %arg1 : i32
    %c1_i32_1 = arith.constant 1 : i32
    %5 = arith.muli %4, %c1_i32_1 : i32
    %6 = tpu.iota {dimensions = array<i32: 0>} : vector<1x128xi32>
    %7 = vector.broadcast %5 : i32 to vector<1x128xi32>
    %8 = arith.addi %7, %6 : vector<1x128xi32>
    %c1_i32_2 = arith.constant 1 : i32
    %9 = vector.broadcast %c1_i32_2 : i32 to vector<1x128xi32>
    %10 = arith.cmpi slt, %8, %9 : vector<1x128xi32>
    %c0 = arith.constant 0 : index
    %c0_3 = arith.constant 0 : index
    %11 = vector.load %arg2[%c0, %c0_3] : memref<1x128xf32, #tpu.memory_space<vmem>>, vector<1x128xf32>
    %c0_4 = arith.constant 0 : index
    %c0_5 = arith.constant 0 : index
    %c0_6 = arith.constant 0 : index
    %12 = vector.load %arg5[%c0_4, %c0_5, %c0_6] : memref<3x1x128xf32, #tpu.memory_space<vmem>>, vector<1x1x128xf32>
    %13 = vector.shape_cast %12 : vector<1x1x128xf32> to vector<1x128xf32>
    %14 = arith.subf %11, %13 : vector<1x128xf32>
    %cst = arith.constant 0.000000e+00 : f32
    %15 = vector.broadcast %cst : f32 to vector<1x128xf32>
    %16 = arith.select %10, %14, %15 : vector<1x128xi1>, vector<1x128xf32>
    %c0_7 = arith.constant 0 : index
    %c0_8 = arith.constant 0 : index
    %c0_9 = arith.constant 0 : index
    %17 = vector.load %arg7[%c0_7, %c0_8, %c0_9] : memref<3x1x128xf32, #tpu.memory_space<vmem>>, vector<1x1x128xf32>
    %18 = vector.shape_cast %17 : vector<1x1x128xf32> to vector<1x128xf32>
    %19 = arith.mulf %16, %16 : vector<1x128xf32>
    %20 = arith.addf %18, %19 : vector<1x128xf32>
    %c0_10 = arith.constant 0 : index
    %c0_11 = arith.constant 0 : index
    %c0_12 = arith.constant 0 : index
    %21 = vector.load %arg7[%c0_10, %c0_11, %c0_12] : memref<3x1x128xf32, #tpu.memory_space<vmem>>, vector<1x1x128xf32>
    %22 = vector.shape_cast %21 : vector<1x1x128xf32> to vector<1x128xf32>
    %23 = vector.shape_cast %20 : vector<1x128xf32> to vector<1x1x128xf32>
    tpu.vector_store %arg7[%c0_10, %c0_11, %c0_12], %23 {strides = array<i32>} : memref<3x1x128xf32, #tpu.memory_space<vmem>>, vector<1x1x128xf32>,
    %c0_13 = arith.constant 0 : index
    %c0_14 = arith.constant 0 : index
    %24 = vector.load %arg3[%c0_13, %c0_14] : memref<1x128xf32, #tpu.memory_space<vmem>>, vector<1x128xf32>
    %c1 = arith.constant 1 : index
    %c0_15 = arith.constant 0 : index
    %c0_16 = arith.constant 0 : index
    %25 = vector.load %arg5[%c1, %c0_15, %c0_16] : memref<3x1x128xf32, #tpu.memory_space<vmem>>, vector<1x1x128xf32>
    %26 = vector.shape_cast %25 : vector<1x1x128xf32> to vector<1x128xf32>
    %27 = arith.subf %24, %26 : vector<1x128xf32>
    %cst_17 = arith.constant 0.000000e+00 : f32
    %28 = vector.broadcast %cst_17 : f32 to vector<1x128xf32>
    %29 = arith.select %10, %27, %28 : vector<1x128xi1>, vector<1x128xf32>
    %c1_18 = arith.constant 1 : index
    %c0_19 = arith.constant 0 : index
    %c0_20 = arith.constant 0 : index
    %30 = vector.load %arg7[%c1_18, %c0_19, %c0_20] : memref<3x1x128xf32, #tpu.memory_space<vmem>>, vector<1x1x128xf32>
    %31 = vector.shape_cast %30 : vector<1x1x128xf32> to vector<1x128xf32>
    %32 = arith.mulf %29, %29 : vector<1x128xf32>
    %33 = arith.addf %31, %32 : vector<1x128xf32>
    %c1_21 = arith.constant 1 : index
    %c0_22 = arith.constant 0 : index
    %c0_23 = arith.constant 0 : index
    %34 = vector.load %arg7[%c1_21, %c0_22, %c0_23] : memref<3x1x128xf32, #tpu.memory_space<vmem>>, vector<1x1x128xf32>
    %35 = vector.shape_cast %34 : vector<1x1x128xf32> to vector<1x128xf32>
    %36 = vector.shape_cast %33 : vector<1x128xf32> to vector<1x1x128xf32>
    tpu.vector_store %arg7[%c1_21, %c0_22, %c0_23], %36 {strides = array<i32>} : memref<3x1x128xf32, #tpu.memory_space<vmem>>, vector<1x1x128xf32>,
    %c0_24 = arith.constant 0 : index
    %c0_25 = arith.constant 0 : index
    %37 = vector.load %arg4[%c0_24, %c0_25] : memref<1x128xf32, #tpu.memory_space<vmem>>, vector<1x128xf32>
    %c2 = arith.constant 2 : index
    %c0_26 = arith.constant 0 : index
    %c0_27 = arith.constant 0 : index
    %38 = vector.load %arg5[%c2, %c0_26, %c0_27] : memref<3x1x128xf32, #tpu.memory_space<vmem>>, vector<1x1x128xf32>
    %39 = vector.shape_cast %38 : vector<1x1x128xf32> to vector<1x128xf32>
    %40 = arith.subf %37, %39 : vector<1x128xf32>
    %cst_28 = arith.constant 0.000000e+00 : f32
    %41 = vector.broadcast %cst_28 : f32 to vector<1x128xf32>
    %42 = arith.select %10, %40, %41 : vector<1x128xi1>, vector<1x128xf32>
    %c2_29 = arith.constant 2 : index
    %c0_30 = arith.constant 0 : index
    %c0_31 = arith.constant 0 : index
    %43 = vector.load %arg7[%c2_29, %c0_30, %c0_31] : memref<3x1x128xf32, #tpu.memory_space<vmem>>, vector<1x1x128xf32>
    %44 = vector.shape_cast %43 : vector<1x1x128xf32> to vector<1x128xf32>
    %45 = arith.mulf %42, %42 : vector<1x128xf32>
    %46 = arith.addf %44, %45 : vector<1x128xf32>
    %c2_32 = arith.constant 2 : index
    %c0_33 = arith.constant 0 : index
    %c0_34 = arith.constant 0 : index
    %47 = vector.load %arg7[%c2_32, %c0_33, %c0_34] : memref<3x1x128xf32, #tpu.memory_space<vmem>>, vector<1x1x128xf32>
    %48 = vector.shape_cast %47 : vector<1x1x128xf32> to vector<1x128xf32>
    %49 = vector.shape_cast %46 : vector<1x128xf32> to vector<1x1x128xf32>
    tpu.vector_store %arg7[%c2_32, %c0_33, %c0_34], %49 {strides = array<i32>} : memref<3x1x128xf32, #tpu.memory_space<vmem>>, vector<1x1x128xf32>,
    %c0_i32_35 = arith.constant 0 : i32
    %50 = arith.cmpi eq, %arg1, %c0_i32_35 : i32
    %51 = arith.extui %50 : i1 to i32
    %c0_i32_36 = arith.constant 0 : i32
    %52 = arith.cmpi ne, %51, %c0_i32_36 : i32
    scf.if %52 {
      %c0_37 = arith.constant 0 : index
      %c0_38 = arith.constant 0 : index
      %c0_39 = arith.constant 0 : index
      %53 = vector.load %arg7[%c0_37, %c0_38, %c0_39] : memref<3x1x128xf32, #tpu.memory_space<vmem>>, vector<1x1x128xf32>
      %54 = vector.shape_cast %53 : vector<1x1x128xf32> to vector<1x128xf32>
      %cst_40 = arith.constant dense<0.000000e+00> : vector<128xf32>
      %55 = vector.multi_reduction <add>, %54, %cst_40 [0] : vector<1x128xf32> to vector<128xf32>
      %56 = vector.shape_cast %55 : vector<128xf32> to vector<1x128xf32>
      %57 = vector.shape_cast %56 : vector<1x128xf32> to vector<1x1x128xf32>
      %c0_41 = arith.constant 0 : index
      %c0_42 = arith.constant 0 : index
      %c0_43 = arith.constant 0 : index
      %58 = vector.load %arg6[%c0_41, %c0_42, %c0_43] : memref<1x3x128xf32, #tpu.memory_space<vmem>>, vector<1x1x128xf32>
      tpu.vector_store %arg6[%c0_41, %c0_42, %c0_43], %57 {strides = array<i32>} : memref<1x3x128xf32, #tpu.memory_space<vmem>>, vector<1x1x128xf32>,
      %c1_44 = arith.constant 1 : index
      %c0_45 = arith.constant 0 : index
      %c0_46 = arith.constant 0 : index
      %59 = vector.load %arg7[%c1_44, %c0_45, %c0_46] : memref<3x1x128xf32, #tpu.memory_space<vmem>>, vector<1x1x128xf32>
      %60 = vector.shape_cast %59 : vector<1x1x128xf32> to vector<1x128xf32>
      %cst_47 = arith.constant dense<0.000000e+00> : vector<128xf32>
      %61 = vector.multi_reduction <add>, %60, %cst_47 [0] : vector<1x128xf32> to vector<128xf32>
      %62 = vector.shape_cast %61 : vector<128xf32> to vector<1x128xf32>
      %63 = vector.shape_cast %62 : vector<1x128xf32> to vector<1x1x128xf32>
      %c0_48 = arith.constant 0 : index
      %c1_49 = arith.constant 1 : index
      %c0_50 = arith.constant 0 : index
      %64 = vector.load %arg6[%c0_48, %c1_49, %c0_50] : memref<1x3x128xf32, #tpu.memory_space<vmem>>, vector<1x1x128xf32>
      tpu.vector_store %arg6[%c0_48, %c1_49, %c0_50], %63 {strides = array<i32>} : memref<1x3x128xf32, #tpu.memory_space<vmem>>, vector<1x1x128xf32>,
      %c2_51 = arith.constant 2 : index
      %c0_52 = arith.constant 0 : index
      %c0_53 = arith.constant 0 : index
      %65 = vector.load %arg7[%c2_51, %c0_52, %c0_53] : memref<3x1x128xf32, #tpu.memory_space<vmem>>, vector<1x1x128xf32>
      %66 = vector.shape_cast %65 : vector<1x1x128xf32> to vector<1x128xf32>
      %cst_54 = arith.constant dense<0.000000e+00> : vector<128xf32>
      %67 = vector.multi_reduction <add>, %66, %cst_54 [0] : vector<1x128xf32> to vector<128xf32>
      %68 = vector.shape_cast %67 : vector<128xf32> to vector<1x128xf32>
      %69 = vector.shape_cast %68 : vector<1x128xf32> to vector<1x1x128xf32>
      %c0_55 = arith.constant 0 : index
      %c2_56 = arith.constant 2 : index
      %c0_57 = arith.constant 0 : index
      %70 = vector.load %arg6[%c0_55, %c2_56, %c0_57] : memref<1x3x128xf32, #tpu.memory_space<vmem>>, vector<1x1x128xf32>
      tpu.vector_store %arg6[%c0_55, %c2_56, %c0_57], %69 {strides = array<i32>} : memref<1x3x128xf32, #tpu.memory_space<vmem>>, vector<1x1x128xf32>,
    } else {
    }
    return
  }
  func.func @transform_0(%arg0: i32, %arg1: i32) -> (i32, i32) {
    %c1_i32 = arith.constant 1 : i32
    %0 = arith.muli %arg0, %c1_i32 : i32
    %1 = arith.addi %0, %arg1 : i32
    %c0_i32 = arith.constant 0 : i32
    %c0_i32_0 = arith.constant 0 : i32
    return %1, %c0_i32 : i32, i32
  }
  func.func @transform_1(%arg0: i32, %arg1: i32) -> (i32, i32) {
    %c1_i32 = arith.constant 1 : i32
    %0 = arith.muli %arg0, %c1_i32 : i32
    %1 = arith.addi %0, %arg1 : i32
    %c0_i32 = arith.constant 0 : i32
    %c0_i32_0 = arith.constant 0 : i32
    return %1, %c0_i32 : i32, i32
  }
  func.func @transform_2(%arg0: i32, %arg1: i32) -> (i32, i32) {
    %c1_i32 = arith.constant 1 : i32
    %0 = arith.muli %arg0, %c1_i32 : i32
    %1 = arith.addi %0, %arg1 : i32
    %c0_i32 = arith.constant 0 : i32
    %c0_i32_0 = arith.constant 0 : i32
    return %1, %c0_i32 : i32, i32
  }
  func.func @transform_3(%arg0: i32, %arg1: i32) -> (i32, i32, i32) {
    %c1_i32 = arith.constant 1 : i32
    %0 = arith.muli %arg0, %c1_i32 : i32
    %1 = arith.addi %0, %arg1 : i32
    %c0_i32 = arith.constant 0 : i32
    %c0_i32_0 = arith.constant 0 : i32
    %c0_i32_1 = arith.constant 0 : i32
    return %c0_i32, %1, %c0_i32_0 : i32, i32, i32
  }
  func.func @transform_4(%arg0: i32, %arg1: i32) -> (i32, i32, i32) {
    %c0_i32 = arith.constant 0 : i32
    %c0_i32_0 = arith.constant 0 : i32
    %c0_i32_1 = arith.constant 0 : i32
    return %arg0, %c0_i32, %c0_i32_0 : i32, i32, i32
  }
}

</mosaic_0001>

<bundles_post_ra>
// kernel: tpu_custom_call.1
= control target key start
LH: loop header
LB: loop body
LE: loop exit
PB: predicated region body
PF: predicated region fallthrough
CT: control target
= control target key end

     0   :  { %9 = vsyncpa [#allocation4], 0  ;;  %s170_s15 = smov [#allocation3]   ;;  %s233_s0 = inlined_call_operand.hbm [shape: f32[1,128], index: 0, kind: input, shape index: {}]   ;;  %s234_s1 = inlined_call_operand.vmem [shape: f32[1,128], index: 1, kind: input, shape index: {}]   ;;  %s235_s2 = inlined_call_operand.vmem [shape: f32[1,128], index: 2, kind: input, shape index: {}]   ;;  %s236_s3 = inlined_call_operand.vmem [shape: f32[3,1,128], index: 3, kind: input, shape index: {}]   ;;  %s237_s4 = inlined_call_operand.vmem [shape: f32[1,3,128], index: 4, kind: output, shape index: {}]  }
   0x1   :  { %s19_s16 = sshll.u32 %s170_s15, 4  ;;  %s146_s19 = scalar_lea.hbm %s233_s0, 16  ;;  %s20_s16 = int_to_ptr.vmem [resolvable:$true] %s19_s16 }
   0x2   :  { %p147_p0 = scmp.ne.s32.totalorder %s233_s0, %s146_s19  ;;  %p150_p1 = scmp.lt.u32.totalorder %s146_s19, %s233_s0 }
   0x4   :  { %p152_p2 = pnand %p150_p1, %p147_p0 }
   0x6   :  { %155 = shalt.err (!%p152_p2)
}
   0x7   :  { %s156_s24 = scalar_lea.vmem %s20_s16, 16  ;;  %s160_s25 = scalar_lea.vmem %s20_s16, 32 }
   0x8   :  { %p157_p3 = scmp.ne.s32.totalorder %s20_s16, %s156_s24  ;;  %p161_p4 = scmp.lt.s32.totalorder %s20_s16, %s20_s16 }
   0x9   :  { %p162_p5 = scmp.lt.s32.totalorder %s160_s25, %s156_s24 }
   0xb   :  { %p163_p6 = por %p162_p5, %p161_p4 }
   0xd   :  { %p164_p7 = pnand %p163_p6, %p157_p3 }
   0xf   :  { %167 = shalt.err (!%p164_p7)
}
  0x10   :  { %22 = dma.hbm_to_vmem [thread:$0]  %s233_s0, 16, %s20_s16, [#allocation4]  }
  0x11   :  { %168 = dma.done.wait [#allocation4], 16  }
  0x12   :  { %169 = vsyncadd [#allocation4], 4294967280  ;;  %v83_v0 = vlaneseq  ;;  %v171_v1 = vmov 0.0   ;;  %v88_v3 = vld [vmem:[#allocation3] sm:$0x1] }
  0x13   :  { %79 = vst [vmem:[#allocation2] sm:$0x1] %v171_v1  ;;  %80 = vst [vmem:[#allocation2 + $0x1] sm:$0x1] %v171_v1  ;;  %v89_v4 = vld [vmem:[%s236_s3] sm:$0x1] }
  0x14   :  { %81 = vst [vmem:[#allocation2 + $0x2] sm:$0x1] %v171_v1  ;;  %v84_v2 = vshrl.u32 %v83_v0, 7  ;;  %v96_v5 = vld [vmem:[%s234_s1] sm:$0x1]  ;;  %v90_v6 = vsub.f32 %v88_v3, %v89_v4 }
  0x15   :  { %v142_v7 = vld [vmem:[%s236_s3 + $0x1] sm:$0x1]  ;;  %v106_v9 = vld [vmem:[%s235_s2] sm:$0x1]  ;;  %v143_v10 = vld [vmem:[%s236_s3 + $0x2] sm:$0x1] }
  0x16   :  { %vm87_vm0 = vcmp.lt.s32.totalorder %v84_v2, 1  ;;  %v99_v8 = vsub.f32 %v96_v5, %v142_v7  ;;  %v109_v13 = vsub.f32 %v106_v9, %v143_v10 }
  0x17   :  { %v91_v11 = vsel %vm87_vm0, %v90_v6, 0.0 }
  0x18   :  { %v93_v14 = vmul.f32 %v91_v11, %v91_v11  ;;  %v100_v15 = vsel %vm87_vm0, %v99_v8, 0.0  ;;  %v110_v18 = vsel %vm87_vm0, %v109_v13, 0.0 }
  0x19   :  { %v103_v17 = vmul.f32 %v100_v15, %v100_v15  ;;  %v113_v21 = vmul.f32 %v110_v18, %v110_v18 }
  0x1a   :  { %v92_v12 = vld [vmem:[#allocation2] sm:$0x1]  ;;  %v102_v16 = vld [vmem:[#allocation2 + $0x1] sm:$0x1] }
  0x1b   :  { %v112_v19 = vld [vmem:[#allocation2 + $0x2] sm:$0x1]  ;;  %v94_v20 = vadd.f32 %v93_v14, %v92_v12  ;;  %v104_v22 = vadd.f32 %v103_v17, %v102_v16 }
  0x1c   :  { %v114_v23 = vadd.f32 %v113_v21, %v112_v19 }
  0x1d   :  { %95 = vst [vmem:[#allocation2] sm:$0x1] %v94_v20  ;;  %105 = vst [vmem:[#allocation2 + $0x1] sm:$0x1] %v104_v22 }
  0x1e   :  { %115 = vst [vmem:[#allocation2 + $0x2] sm:$0x1] %v114_v23 }
  0x24   :  { %v119_v24 = vld [vmem:[#allocation2] sm:$0x3]  }
  0x25   :  { %121 = vst [vmem:[%s237_s4] sm:$0x3] %v119_v24   ;;  %v125_v25 = vld [vmem:[#allocation2 + $0x2] sm:$0x1] }
  0x26   :  { %127 = vst [vmem:[%s237_s4 + $0x2] sm:$0x1] %v125_v25 }
  0x27   :  { %132 = vsyncpa [#allocation4], 1 }

</bundles_post_ra>
